<compile_context>
chip_gen: v7x
topology: tpu7x:2x2x1
jax: 0.10.0
libtpu: 0.0.40
codegen_flags: <defaults>
</compile_context>

<pallas_src>
import functools

import jax
import jax.numpy as jnp
from jax import lax
from jax.experimental import pallas as pl
from jax.experimental.pallas import tpu as pltpu

_LANES = 128


def _cdiv(a, b):
    return -(-a // b)


def _round_up(x, m):
    return ((x + m - 1) // m) * m


def _tpu_kind():
    try:
        return jax.devices()[0].device_kind.lower()
    except Exception:
        return ""


def _sq_diff_partial_kernel(a_ref, b_ref, o_ref, acc_ref, *,
                            block_rows, rows_total, steps_per_part):
    """Per-part partial sum of (a - b)^2 over a stream of (block_rows, 128) tiles."""
    p = pl.program_id(0)          # "parallel" part axis (2 TCs on v7x, 1 elsewhere)
    i = pl.program_id(1)          # "arbitrary" reduction axis

    @pl.when(i == 0)
    def _init():
        acc_ref[...] = jnp.zeros_like(acc_ref)

    d = a_ref[...].astype(jnp.float32) - b_ref[...].astype(jnp.float32)
    sq = d * d

    # Logical (unclamped) row offset of this tile; rows past the end of the
    # data (ragged tail of the last block / clamped duplicate blocks) are
    # masked to zero.  Unconditional mask: VPU filler is free here (HBM-bound).
    row0 = (p * steps_per_part + i) * block_rows
    rid = lax.broadcasted_iota(jnp.int32, sq.shape, 0) + row0
    sq = jnp.where(rid < rows_total, sq, 0.0)

    # Tile-aligned regroup to (block_rows//8, 8, 128) + vreg-wise adds into the
    # (8, 128) accumulator — pure VPU, no cross-lane work in the hot loop.
    acc_ref[...] += sq.reshape(-1, 8, _LANES).sum(axis=0)

    @pl.when(i == pl.num_programs(1) - 1)
    def _finalize():
        o_ref[...] = acc_ref[...][None]


def mse_loss(a, b, *, block_rows=None, num_parts=None):
    """mean((a - b)**2) computed by a Pallas TPU kernel (torch MSELoss semantics)."""
    assert a.shape == b.shape, (a.shape, b.shape)
    n = a.size
    assert n > 0

    kind = _tpu_kind()
    is_v5 = "v5" in kind
    is_v7 = ("v7" in kind) or ("7x" in kind)

    a_flat = jnp.ravel(a)          # metadata-only reshape, no extra HBM pass
    b_flat = jnp.ravel(b)

    rem = n % _LANES
    n_main = n - rem

    total = jnp.float32(0.0)

    if rem:
        # Rare ragged case: the <=127-element tail is summed in plain JAX
        # (tiny), instead of padding/copying both full inputs.
        ta = a_flat[n_main:].astype(jnp.float32)
        tb = b_flat[n_main:].astype(jnp.float32)
        total = total + jnp.sum((ta - tb) ** 2)

    if n_main:
        a2 = a_flat[:n_main].reshape(-1, _LANES)
        b2 = b_flat[:n_main].reshape(-1, _LANES)
        rows = a2.shape[0]
        assert rows < 2**31, "row index arithmetic is int32"

        a_item = jnp.dtype(a.dtype).itemsize
        b_item = jnp.dtype(b.dtype).itemsize
        itemsize = min(a_item, b_item)
        # Sublane alignment: 8 rows/vreg for 4-byte dtypes, 16 for bf16, 32 for 8-bit.
        row_align = max(8, 32 // max(itemsize, 1))

        if block_rows is None:
            # Hold per-step HBM bytes per input at ~4 MiB (v6e/v7x) / ~2 MiB (v5e)
            # regardless of dtype.  Double-buffered footprint: 2 inputs x 2 bufs
            # = 16 MiB (8 MiB on v5e), inside every default scoped-VMEM limit.
            tgt_bytes = (2 << 20) if is_v5 else (4 << 20)
            block_rows = tgt_bytes // (_LANES * itemsize)
        block_rows = max(row_align, (block_rows // row_align) * row_align)
        block_rows = min(block_rows, _round_up(rows, row_align))

        steps_total = _cdiv(rows, block_rows)
        if num_parts is None:
            num_parts = 2 if is_v7 else 1   # shard across TCs only on v7x
        num_parts = max(1, min(num_parts, steps_total))
        steps_per_part = _cdiv(steps_total, num_parts)

        if num_parts == 1:
            def in_index_map(p, i):
                return (i, 0)
        else:
            last_block = steps_total - 1

            def in_index_map(p, i):
                # Clamp so the DMA never indexes past the last block; the kernel
                # masks the (fully out-of-range) duplicate tile via its logical row0.
                return (jnp.minimum(p * steps_per_part + i, last_block), 0)

        kernel = functools.partial(
            _sq_diff_partial_kernel,
            block_rows=block_rows,
            rows_total=rows,
            steps_per_part=steps_per_part,
        )

        cost = pl.CostEstimate(
            flops=3 * n_main,                       # sub + mul + add per element
            transcendentals=0,
            bytes_accessed=n_main * (a_item + b_item)
            + num_parts * 8 * _LANES * 4,
        )

        partials = pl.pallas_call(
            kernel,
            out_shape=jax.ShapeDtypeStruct((num_parts, 8, _LANES), jnp.float32),
            grid_spec=pltpu.PrefetchScalarGridSpec(
                num_scalar_prefetch=0,
                grid=(num_parts, steps_per_part),
                in_specs=[
                    pl.BlockSpec((block_rows, _LANES), in_index_map),
                    pl.BlockSpec((block_rows, _LANES), in_index_map),
                ],
                out_specs=pl.BlockSpec((1, 8, _LANES), lambda p, i: (p, 0, 0)),
                scratch_shapes=[pltpu.VMEM((8, _LANES), jnp.float32)],
            ),
            compiler_params=pltpu.CompilerParams(
                dimension_semantics=("parallel", "arbitrary"),
            ),
            cost_estimate=cost,
        )(a2, b2)

        # Tiny final combine (num_parts * 8 * 128 elements).
        total = total + jnp.sum(partials)

    return total * jnp.float32(1.0 / n)


class LossOnPredDict:
    """JAX/Pallas port of rhodin's LossOnPredDict.

    forward(pred_dict, label_dict) = weight * loss(pred_dict[key], pred_dict[other_key])
    (label_dict is intentionally unused, matching the PyTorch module.)
    """

    def __init__(self, key, other_key, loss, weight=1):
        self.key = key
        self.other_key = other_key
        self.loss = loss
        self.weight = weight

    def __call__(self, pred_dict, label_dict):
        return self.weight * self.loss(pred_dict[self.key], pred_dict[self.other_key])

    forward = __call__


if __name__ == "__main__":
    # Small deterministic inputs: two NCHW prediction tensors in pred_dict.
    B, C, H, W = 2, 4, 16, 16
    key = jax.random.PRNGKey(0)
    k1, k2 = jax.random.split(key)
    pred_a = jax.random.normal(k1, (B, C, H, W), dtype=jnp.float32)
    pred_b = jax.random.normal(k2, (B, C, H, W), dtype=jnp.float32)

    pred_dict = {"3D": pred_a, "3D_global": pred_b}
    label_dict = {}  # unused by this module

    module = LossOnPredDict(
        key="3D", other_key="3D_global", loss=mse_loss, weight=0.5
    )

    loss = module(pred_dict, label_dict)
    loss = jax.block_until_ready(loss)

    # Sanity check against plain-JAX reference semantics of the PyTorch module
    # with torch.nn.MSELoss as the inner loss.
    ref = 0.5 * jnp.mean((pred_a - pred_b) ** 2)
    assert jnp.allclose(loss, ref, rtol=1e-5, atol=1e-6), (loss, ref)

    print("KERNEL_OK")
</pallas_src>

<mosaic_0001>
module attributes {stable_mosaic.version = 11 : i64} {
  func.func @_sq_diff_partial_kernel(%arg0: i32, %arg1: i32, %arg2: memref<16x128xf32, #tpu.memory_space<vmem>>, %arg3: memref<16x128xf32, #tpu.memory_space<vmem>>, %arg4: memref<1x8x128xf32, #tpu.memory_space<vmem>>, %arg5: memref<8x128xf32, #tpu.memory_space<vmem>>) attributes {dimension_semantics = [#tpu.dimension_semantics<parallel>, #tpu.dimension_semantics<arbitrary>], iteration_bounds = array<i64: 1, 1>, scalar_prefetch = 0 : i64, scratch_operands = 1 : i64, tpu.core_type = #tpu.core_type<tc>, window_params = [{transform_indices = @transform_0, window_bounds = array<i64: 16, 128>}, {transform_indices = @transform_1, window_bounds = array<i64: 16, 128>}, {transform_indices = @transform_2, window_bounds = array<i64: 1, 8, 128>}]} {
    %c0_i32 = arith.constant 0 : i32
    %0 = arith.cmpi eq, %arg1, %c0_i32 : i32
    %1 = arith.extui %0 : i1 to i32
    %c0_i32_0 = arith.constant 0 : i32
    %2 = arith.cmpi ne, %1, %c0_i32_0 : i32
    scf.if %2 {
      %cst_12 = arith.constant 0.000000e+00 : f32
      %25 = vector.broadcast %cst_12 : f32 to vector<8x128xf32>
      %c0_13 = arith.constant 0 : index
      %c0_14 = arith.constant 0 : index
      %26 = vector.load %arg5[%c0_13, %c0_14] : memref<8x128xf32, #tpu.memory_space<vmem>>, vector<8x128xf32>
      tpu.vector_store %arg5[%c0_13, %c0_14], %25 {strides = array<i32>} : memref<8x128xf32, #tpu.memory_space<vmem>>, vector<8x128xf32>,
    } else {
    }
    %c0 = arith.constant 0 : index
    %c0_1 = arith.constant 0 : index
    %3 = vector.load %arg2[%c0, %c0_1] : memref<16x128xf32, #tpu.memory_space<vmem>>, vector<16x128xf32>
    %c0_2 = arith.constant 0 : index
    %c0_3 = arith.constant 0 : index
    %4 = vector.load %arg3[%c0_2, %c0_3] : memref<16x128xf32, #tpu.memory_space<vmem>>, vector<16x128xf32>
    %5 = arith.subf %3, %4 : vector<16x128xf32>
    %6 = arith.mulf %5, %5 : vector<16x128xf32>
    %c1_i32 = arith.constant 1 : i32
    %7 = arith.muli %arg0, %c1_i32 : i32
    %8 = arith.addi %7, %arg1 : i32
    %c16_i32 = arith.constant 16 : i32
    %9 = arith.muli %8, %c16_i32 : i32
    %10 = tpu.iota {dimensions = array<i32: 0>} : vector<16x128xi32>
    %11 = vector.broadcast %9 : i32 to vector<16x128xi32>
    %12 = arith.addi %10, %11 : vector<16x128xi32>
    %c16_i32_4 = arith.constant 16 : i32
    %13 = vector.broadcast %c16_i32_4 : i32 to vector<16x128xi32>
    %14 = arith.cmpi slt, %12, %13 : vector<16x128xi32>
    %cst = arith.constant 0.000000e+00 : f32
    %15 = vector.broadcast %cst : f32 to vector<16x128xf32>
    %16 = arith.select %14, %6, %15 : vector<16x128xi1>, vector<16x128xf32>
    %c0_5 = arith.constant 0 : index
    %c0_6 = arith.constant 0 : index
    %17 = vector.load %arg5[%c0_5, %c0_6] : memref<8x128xf32, #tpu.memory_space<vmem>>, vector<8x128xf32>
    %18 = vector.shape_cast %16 : vector<16x128xf32> to vector<2x8x128xf32>
    %cst_7 = arith.constant dense<0.000000e+00> : vector<8x128xf32>
    %19 = vector.multi_reduction <add>, %18, %cst_7 [0] : vector<2x8x128xf32> to vector<8x128xf32>
    %20 = arith.addf %17, %19 : vector<8x128xf32>
    %c0_8 = arith.constant 0 : index
    %c0_9 = arith.constant 0 : index
    %21 = vector.load %arg5[%c0_8, %c0_9] : memref<8x128xf32, #tpu.memory_space<vmem>>, vector<8x128xf32>
    tpu.vector_store %arg5[%c0_8, %c0_9], %20 {strides = array<i32>} : memref<8x128xf32, #tpu.memory_space<vmem>>, vector<8x128xf32>,
    %c0_i32_10 = arith.constant 0 : i32
    %22 = arith.cmpi eq, %arg1, %c0_i32_10 : i32
    %23 = arith.extui %22 : i1 to i32
    %c0_i32_11 = arith.constant 0 : i32
    %24 = arith.cmpi ne, %23, %c0_i32_11 : i32
    scf.if %24 {
      %c0_12 = arith.constant 0 : index
      %c0_13 = arith.constant 0 : index
      %25 = vector.load %arg5[%c0_12, %c0_13] : memref<8x128xf32, #tpu.memory_space<vmem>>, vector<8x128xf32>
      %26 = vector.shape_cast %25 : vector<8x128xf32> to vector<1x8x128xf32>
      %c0_14 = arith.constant 0 : index
      %c0_15 = arith.constant 0 : index
      %c0_16 = arith.constant 0 : index
      %27 = vector.load %arg4[%c0_14, %c0_15, %c0_16] : memref<1x8x128xf32, #tpu.memory_space<vmem>>, vector<1x8x128xf32>
      tpu.vector_store %arg4[%c0_14, %c0_15, %c0_16], %26 {strides = array<i32>} : memref<1x8x128xf32, #tpu.memory_space<vmem>>, vector<1x8x128xf32>,
    } else {
    }
    return
  }
  func.func @transform_0(%arg0: i32, %arg1: i32) -> (i32, i32) {
    %c0_i32 = arith.constant 0 : i32
    %c0_i32_0 = arith.constant 0 : i32
    return %arg1, %c0_i32 : i32, i32
  }
  func.func @transform_1(%arg0: i32, %arg1: i32) -> (i32, i32) {
    %c0_i32 = arith.constant 0 : i32
    %c0_i32_0 = arith.constant 0 : i32
    return %arg1, %c0_i32 : i32, i32
  }
  func.func @transform_2(%arg0: i32, %arg1: i32) -> (i32, i32, i32) {
    %c0_i32 = arith.constant 0 : i32
    %c0_i32_0 = arith.constant 0 : i32
    %c0_i32_1 = arith.constant 0 : i32
    return %arg0, %c0_i32, %c0_i32_0 : i32, i32, i32
  }
}

</mosaic_0001>

<bundles_post_ra>
// kernel: tpu_custom_call.1
= control target key start
LH: loop header
LB: loop body
LE: loop exit
PB: predicated region body
PF: predicated region fallthrough
CT: control target
= control target key end

     0   :  { %7 = vsyncpa [#allocation4], 0  ;;  %s223_s0 = inlined_call_operand.hbm [shape: f32[16,128], index: 0, kind: input, shape index: {}]   ;;  %s224_s1 = inlined_call_operand.hbm [shape: f32[16,128], index: 1, kind: input, shape index: {}]   ;;  %s225_s2 = inlined_call_operand.hbm [shape: f32[1,8,128], index: 2, kind: output, shape index: {}]  }
   0x1   :  { %8 = vsyncpa [#allocation7], 0 }
   0x2   :  { %9 = vsyncpa [#allocation5], 0  ;;  %s167_s9 = smov [#allocation3]   ;;  %s95_s13 = scalar_lea.hbm %s223_s0, 256 }
   0x3   :  { %s15_s10 = sshll.u32 %s167_s9, 4  ;;  %p96_p0 = scmp.ne.s32.totalorder %s223_s0, %s95_s13  ;;  %s16_s10 = int_to_ptr.vmem [resolvable:$true] %s15_s10 }
   0x4   :  { %p99_p1 = scmp.lt.u32.totalorder %s95_s13, %s223_s0 }
   0x6   :  { %p101_p2 = pnand %p99_p1, %p96_p0 }
   0x8   :  { %104 = shalt.err (!%p101_p2)
}
   0x9   :  { %s105_s18 = scalar_lea.vmem %s16_s10, 256  ;;  %p110_p4 = scmp.lt.s32.totalorder %s16_s10, %s16_s10 }
   0xa   :  { %p106_p3 = scmp.ne.s32.totalorder %s16_s10, %s105_s18  ;;  %p111_p5 = scmp.lt.s32.totalorder %s105_s18, %s105_s18 }
   0xc   :  { %p112_p6 = por %p111_p5, %p110_p4 }
   0xe   :  { %p113_p7 = pnand %p112_p6, %p106_p3 }
  0x10   :  { %116 = shalt.err (!%p113_p7)
}
  0x11   :  { %s168_s19 = smov 128   ;;  %s169_s20 = smov 8  }
  0x12   :  { %21 = dma.hbm_to_vmem [thread:$0]  %s223_s0, 256, %s16_s10, [#allocation4], %s168_s19, %s168_s19, %s169_s20  }
  0x13   :  { %s170_s23 = smov [#allocation6]   ;;  %s117_s27 = scalar_lea.hbm %s224_s1, 256 }
  0x14   :  { %s27_s24 = sshll.u32 %s170_s23, 4  ;;  %p118_p8 = scmp.ne.s32.totalorder %s224_s1, %s117_s27  ;;  %s28_s24 = int_to_ptr.vmem [resolvable:$true] %s27_s24 }
  0x15   :  { %p121_p9 = scmp.lt.u32.totalorder %s117_s27, %s224_s1 }
  0x17   :  { %p123_p10 = pnand %p121_p9, %p118_p8 }
  0x19   :  { %126 = shalt.err (!%p123_p10)
}
  0x1a   :  { %s127_s4 = scalar_lea.vmem %s28_s24, 256  ;;  %p132_p12 = scmp.lt.s32.totalorder %s28_s24, %s28_s24 }
  0x1b   :  { %p128_p11 = scmp.ne.s32.totalorder %s28_s24, %s127_s4  ;;  %p133_p13 = scmp.lt.s32.totalorder %s127_s4, %s127_s4 }
  0x1d   :  { %p134_p0 = por %p133_p13, %p132_p12 }
  0x1f   :  { %p135_p1 = pnand %p134_p0, %p128_p11 }
  0x21   :  { %138 = shalt.err (!%p135_p1)
}
  0x22   :  { %33 = dma.hbm_to_vmem [thread:$0]  %s224_s1, 256, %s28_s24, [#allocation7], %s168_s19, %s168_s19, %s169_s20  }
  0x23   :  { %161 = dma.done.wait [#allocation4], 256  }
  0x24   :  { %162 = vsyncadd [#allocation4], 4294967040 }
  0x25   :  { %163 = dma.done.wait [#allocation7], 256  }
  0x26   :  { %164 = vsyncadd [#allocation7], 4294967040  ;;  %v45_v0 = vld [vmem:[#allocation3] sm:$0xff]  ;;  %v46_v1 = vld [vmem:[#allocation3 + $0x8] sm:$0xff]  ;;  %s171_s6 = smov [#allocation8]  }
  0x27   :  { %v47_v2 = vld [vmem:[#allocation6] sm:$0xff]  ;;  %v48_v3 = vld [vmem:[#allocation6 + $0x8] sm:$0xff]  ;;  %s80_s7 = sshll.u32 %s171_s6, 4  ;;  %s81_s7 = int_to_ptr.vmem [resolvable:$true] %s80_s7 }
  0x28   :  { %v49_v4 = vsub.f32 %v45_v0, %v47_v2  ;;  %v50_v5 = vsub.f32 %v46_v1, %v48_v3  ;;  %s139_s8 = scalar_lea.vmem %s81_s7, 128  ;;  %p144_p3 = scmp.lt.s32.totalorder %s81_s7, %s81_s7 }
  0x29   :  { %p140_p2 = scmp.ne.s32.totalorder %s81_s7, %s139_s8  ;;  %p145_p4 = scmp.lt.s32.totalorder %s139_s8, %s139_s8 }
  0x2a   :  { %v51_v6 = vmul.f32 %v49_v4, %v49_v4  ;;  %v52_v7 = vmul.f32 %v50_v5, %v50_v5 }
  0x2b   :  { %p146_p5 = por %p145_p4, %p144_p3 }
  0x2c   :  { %v66_v8 = vadd.f32 %v52_v7, %v51_v6 }
  0x2d   :  { %p147_p6 = pnand %p146_p5, %p140_p2 }
  0x2e   :  { %73 = vst [vmem:[#allocation8] sm:$0xff] %v66_v8 }
  0x2f   :  { %150 = shalt.err (!%p147_p6)
}
  0x30   :  { %s151_s10 = scalar_lea.hbm %s225_s2, 128 }
  0x31   :  { %p152_p7 = scmp.ne.s32.totalorder %s225_s2, %s151_s10  ;;  %p155_p8 = scmp.lt.u32.totalorder %s151_s10, %s225_s2 }
  0x33   :  { %p157_p9 = pnand %p155_p8, %p152_p7 }
  0x35   :  { %160 = shalt.err (!%p157_p9)
}
  0x36   :  { %83 = dma.vmem_to_hbm [thread:$0]  %s81_s7, 128, %s225_s2, [#allocation5]  }
  0x37   :  { %165 = dma.done.wait [#allocation5], 128  }
  0x38   :  { %166 = vsyncadd [#allocation5], 4294967168 }
  0x39   :  { %87 = vsyncpa [#allocation4], 1 }
  0x3a   :  { %88 = vsyncpa [#allocation7], 1 }
  0x3b   :  { %89 = vsyncpa [#allocation5], 1 }

</bundles_post_ra>
